<compile_context>
chip_gen: v5e
topology: v5e:2x2
jax: 0.10.0
libtpu: 0.0.40
codegen_flags: <defaults>
</compile_context>

<pallas_src>
import functools
import math

import jax
import jax.numpy as jnp
from jax.experimental import pallas as pl
from jax.experimental.pallas import tpu as pltpu


# ---------------------------------------------------------------------------
# Generation-aware VMEM budget and tile derivation
# ---------------------------------------------------------------------------

def _vmem_budget_bytes() -> int:
    try:
        cap = int(pltpu.get_tpu_info().vmem_capacity_bytes)   # 128 MiB (v5e/v6e), 64 MiB (v7x)
    except Exception:
        cap = 64 << 20                                         # assume the smallest (v7x)
    cap = min(cap, 128 << 20)
    return (cap * 5) // 8                                      # headroom for Mosaic scratch


_VMEM_BUDGET = _vmem_budget_bytes()
_VMEM_LIMIT = int(min(_VMEM_BUDGET + (8 << 20), 100 << 20))


def _pick_mm_tiles(m, k, n, *, n_extra_mn=0, k_full_only=False):
    """Pick (tm, tn, tk) for an (m,k)@(k,n) matmul.

    Prefers large tn, then large tm (cuts operand re-streaming), then the largest K tile
    that still fits.  tk always divides k exactly (OOB K-padding would corrupt the f32
    accumulator); partial tm / tn blocks are masked by Pallas.
    """
    def fits(tm, tn, tk):
        # 2x: double-buffered pipeline blocks; + one resident f32 accumulator.
        blocks = tm * tk + tk * tn + (1 + n_extra_mn) * tm * tn + 4 * tn + 2 * k
        return 2 * blocks * 4 + tm * tn * 4 <= _VMEM_BUDGET

    if n <= 1024 or n % 128 != 0:
        tn_cands = [n]                                # full width: always a legal block
    else:
        tn_cands = [t for t in (1024, 512, 256, 128) if t <= n]

    tm_cands = sorted({min(t, m) for t in (512, 256, 128, 64, 32, 16, 8)}, reverse=True)

    if k_full_only or k <= 2048 or k % 128 != 0:
        tk_cands = [k]
    else:
        tk_cands = [k] + [t for t in (2048, 1024, 512, 256, 128) if k % t == 0]

    for tn in tn_cands:
        for tm in tm_cands:
            for tk in tk_cands:
                if fits(tm, tn, tk):
                    return tm, tn, tk
    return tm_cands[-1], tn_cands[-1], tk_cands[-1]


# ---------------------------------------------------------------------------
# Kernel 1: LayerNorm (LHS prologue) + matmul + bias        (used for both in-projections)
# ---------------------------------------------------------------------------

def _ln_matmul_kernel(x_ref, lnw_ref, lnb_ref, w_ref, b_ref, o_ref, *, eps):
    x = x_ref[...].astype(jnp.float32)
    mean = jnp.mean(x, axis=-1, keepdims=True)
    xc = x - mean
    var = jnp.mean(xc * xc, axis=-1, keepdims=True)
    y = xc * jax.lax.rsqrt(var + eps)
    y = y * lnw_ref[...].astype(jnp.float32) + lnb_ref[...].astype(jnp.float32)
    acc = jnp.dot(y.astype(jnp.bfloat16), w_ref[...],          # bf16 x bf16 -> f32 acc
                  preferred_element_type=jnp.float32)
    o_ref[...] = (acc + b_ref[...].astype(jnp.float32)).astype(o_ref.dtype)


def ln_linear(x2, ln_w, ln_b, w_t_bf16, bias_f32, *, eps=1e-5):
    """LayerNorm(x2) @ w_t + bias, with w_t (K, N) pre-cast to bf16."""
    m, k = x2.shape
    k2, n = w_t_bf16.shape
    assert k == k2
    tm, tn, _ = _pick_mm_tiles(m, k, n, k_full_only=True)       # LN needs the full feature row
    return pl.pallas_call(
        functools.partial(_ln_matmul_kernel, eps=eps),
        out_shape=jax.ShapeDtypeStruct((m, n), x2.dtype),
        grid_spec=pltpu.PrefetchScalarGridSpec(
            num_scalar_prefetch=0,
            grid=(pl.cdiv(m, tm), pl.cdiv(n, tn)),
            in_specs=[
                pl.BlockSpec((tm, k), lambda i, j: (i, 0)),
                pl.BlockSpec((1, k), lambda i, j: (0, 0)),
                pl.BlockSpec((1, k), lambda i, j: (0, 0)),
                pl.BlockSpec((k, tn), lambda i, j: (0, j)),
                pl.BlockSpec((1, tn), lambda i, j: (0, j)),
            ],
            out_specs=pl.BlockSpec((tm, tn), lambda i, j: (i, j)),
        ),
        compiler_params=pltpu.CompilerParams(
            dimension_semantics=("parallel", "parallel"),
            vmem_limit_bytes=_VMEM_LIMIT,
        ),
        cost_estimate=pl.CostEstimate(
            flops=2 * m * n * k, transcendentals=m,
            bytes_accessed=4 * (m * k + m * n) + 2 * k * n),
    )(x2,
      ln_w.reshape(1, k).astype(jnp.float32),
      ln_b.reshape(1, k).astype(jnp.float32),
      w_t_bf16,
      bias_f32.reshape(1, n))


# ---------------------------------------------------------------------------
# Kernel 2: fused multi-head self-attention, one batch per grid step
#           input  = qkv projection (rows, 3C) in [q | k | v] column order
#           output = (rows, C) token-major (no head transposes touch HBM)
# ---------------------------------------------------------------------------

def _mhsa_kernel(qkv_ref, o_ref, *, num_heads, head_dim, scale):
    c = num_heads * head_dim
    for h in range(num_heads):                                  # static unroll over heads
        q = qkv_ref[:, h * head_dim:(h + 1) * head_dim].astype(jnp.float32) * scale
        k = qkv_ref[:, c + h * head_dim:c + (h + 1) * head_dim]
        v = qkv_ref[:, 2 * c + h * head_dim:2 * c + (h + 1) * head_dim]
        s = jax.lax.dot_general(
            q.astype(jnp.bfloat16), k.astype(jnp.bfloat16),
            (((1,), (1,)), ((), ())), preferred_element_type=jnp.float32)
        m = jnp.max(s, axis=-1, keepdims=True)
        p = jnp.exp(s - m)
        denom = jnp.sum(p, axis=-1, keepdims=True)
        out = jnp.dot(p.astype(jnp.bfloat16), v.astype(jnp.bfloat16),
                      preferred_element_type=jnp.float32)
        out = out * pl.reciprocal(denom, approx=True)
        o_ref[:, h * head_dim:(h + 1) * head_dim] = out.astype(o_ref.dtype)


def mhsa(y_qkv, *, batch, seq, num_heads, head_dim):
    rows, w = y_qkv.shape
    c = num_heads * head_dim
    assert w == 3 * c and rows == batch * seq
    # TODO(synk): seq must be a multiple of 8 (or batch == 1) for the per-batch block; pad
    # tokens upstream for sequences like ViT's N=197.
    scale = head_dim ** -0.5
    return pl.pallas_call(
        functools.partial(_mhsa_kernel, num_heads=num_heads, head_dim=head_dim, scale=scale),
        out_shape=jax.ShapeDtypeStruct((rows, c), y_qkv.dtype),
        grid_spec=pltpu.PrefetchScalarGridSpec(
            num_scalar_prefetch=0,
            grid=(batch,),
            in_specs=[pl.BlockSpec((seq, 3 * c), lambda b: (b, 0))],
            out_specs=pl.BlockSpec((seq, c), lambda b: (b, 0)),
        ),
        compiler_params=pltpu.CompilerParams(
            dimension_semantics=("parallel",),
            vmem_limit_bytes=_VMEM_LIMIT,
        ),
    )(y_qkv)


# ---------------------------------------------------------------------------
# Kernel 3: plain matmul + bias  (attention output projection)
# ---------------------------------------------------------------------------

def _matmul_bias_kernel(a_ref, w_ref, b_ref, o_ref, acc_ref):
    @pl.when(pl.program_id(2) == 0)
    def _init():
        acc_ref[...] = jnp.zeros_like(acc_ref)

    acc_ref[...] += jnp.dot(a_ref[...].astype(jnp.bfloat16), w_ref[...],
                            preferred_element_type=jnp.float32)

    @pl.when(pl.program_id(2) == pl.num_programs(2) - 1)
    def _finalize():
        o_ref[...] = (acc_ref[...] + b_ref[...].astype(jnp.float32)).astype(o_ref.dtype)


def linear(x2, w_t_bf16, bias_f32):
    m, k = x2.shape
    k2, n = w_t_bf16.shape
    assert k == k2
    tm, tn, tk = _pick_mm_tiles(m, k, n)
    assert k % tk == 0
    return pl.pallas_call(
        _matmul_bias_kernel,
        out_shape=jax.ShapeDtypeStruct((m, n), x2.dtype),
        grid_spec=pltpu.PrefetchScalarGridSpec(
            num_scalar_prefetch=0,
            grid=(pl.cdiv(m, tm), pl.cdiv(n, tn), k // tk),
            in_specs=[
                pl.BlockSpec((tm, tk), lambda i, j, kk: (i, kk)),
                pl.BlockSpec((tk, tn), lambda i, j, kk: (kk, j)),
                pl.BlockSpec((1, tn), lambda i, j, kk: (0, j)),
            ],
            out_specs=pl.BlockSpec((tm, tn), lambda i, j, kk: (i, j)),
            scratch_shapes=[pltpu.VMEM((tm, tn), jnp.float32)],
        ),
        compiler_params=pltpu.CompilerParams(
            dimension_semantics=("parallel", "parallel", "arbitrary"),
            vmem_limit_bytes=_VMEM_LIMIT,
        ),
        cost_estimate=pl.CostEstimate(
            flops=2 * m * n * k, transcendentals=0,
            bytes_accessed=4 * (m * k + m * n) + 2 * k * n),
    )(x2, w_t_bf16, bias_f32.reshape(1, n))


# ---------------------------------------------------------------------------
# Kernel 4: GELU (LHS prologue) + mlp_out matmul + bias + LayerScale + residual (epilogue)
# ---------------------------------------------------------------------------

def _mlp_out_residual_kernel(a_ref, w_ref, b_ref, xres_ref, attn_ref, g_ref, o_ref, acc_ref):
    @pl.when(pl.program_id(2) == 0)
    def _init():
        acc_ref[...] = jnp.zeros_like(acc_ref)

    # TODO(synk): PyTorch nn.GELU default is exact erf; tanh approximation used here (~3e-4).
    a = jax.nn.gelu(a_ref[...].astype(jnp.float32), approximate=True)
    acc_ref[...] += jnp.dot(a.astype(jnp.bfloat16), w_ref[...],
                            preferred_element_type=jnp.float32)

    @pl.when(pl.program_id(2) == pl.num_programs(2) - 1)
    def _finalize():
        mlp = acc_ref[...] + b_ref[...].astype(jnp.float32)
        upd = (attn_ref[...].astype(jnp.float32) + mlp) * g_ref[...].astype(jnp.float32)
        o_ref[...] = (xres_ref[...].astype(jnp.float32) + upd).astype(o_ref.dtype)


def mlp_out_residual(y_mlp, w_t_bf16, bias_f32, x_res, attn_proj, gamma_f32):
    m, k = y_mlp.shape
    k2, n = w_t_bf16.shape
    assert k == k2 and x_res.shape == (m, n) and attn_proj.shape == (m, n)
    tm, tn, tk = _pick_mm_tiles(m, k, n, n_extra_mn=2)
    assert k % tk == 0
    return pl.pallas_call(
        _mlp_out_residual_kernel,
        out_shape=jax.ShapeDtypeStruct((m, n), x_res.dtype),
        grid_spec=pltpu.PrefetchScalarGridSpec(
            num_scalar_prefetch=0,
            grid=(pl.cdiv(m, tm), pl.cdiv(n, tn), k // tk),
            in_specs=[
                pl.BlockSpec((tm, tk), lambda i, j, kk: (i, kk)),
                pl.BlockSpec((tk, tn), lambda i, j, kk: (kk, j)),
                pl.BlockSpec((1, tn), lambda i, j, kk: (0, j)),
                pl.BlockSpec((tm, tn), lambda i, j, kk: (i, j)),
                pl.BlockSpec((tm, tn), lambda i, j, kk: (i, j)),
                pl.BlockSpec((1, tn), lambda i, j, kk: (0, j)),
            ],
            out_specs=pl.BlockSpec((tm, tn), lambda i, j, kk: (i, j)),
            scratch_shapes=[pltpu.VMEM((tm, tn), jnp.float32)],
        ),
        compiler_params=pltpu.CompilerParams(
            dimension_semantics=("parallel", "parallel", "arbitrary"),
            vmem_limit_bytes=_VMEM_LIMIT,
        ),
        cost_estimate=pl.CostEstimate(
            flops=2 * m * n * k, transcendentals=m * k,
            bytes_accessed=4 * (m * k + 3 * m * n) + 2 * k * n),
    )(y_mlp, w_t_bf16, bias_f32.reshape(1, n), x_res, attn_proj, gamma_f32.reshape(1, n))


# ---------------------------------------------------------------------------
# ParallelScalingBlock forward (params in torch (out, in) layout)
# ---------------------------------------------------------------------------

def parallel_scaling_block(x, params, *, num_heads, eps=1e-5):
    B, N, C = x.shape
    H = num_heads
    Dh = C // H
    rows = B * N
    mlp_hidden = params["mlp_bias"].shape[0]

    x2 = x.reshape(rows, C)

    # in_proj bias exactly mirrors the reference module: cat(qkv_bias, mlp_bias) applied
    # positionally to the output columns, which are then split [mlp_hidden, C, C, C].
    in_bias = jnp.concatenate([params["qkv_bias"], params["mlp_bias"]]).astype(jnp.float32)
    w_in = params["in_proj_w"]                                   # (mlp_hidden + 3C, C)
    # Pre-laid-out bf16 weights (a real model would store them this way once).
    w_mlp_in_t = w_in[:mlp_hidden].T.astype(jnp.bfloat16)        # (C, mlp_hidden)
    w_qkv_in_t = w_in[mlp_hidden:].T.astype(jnp.bfloat16)        # (C, 3C)
    b_mlp_in = in_bias[:mlp_hidden]
    b_qkv_in = in_bias[mlp_hidden:]

    # LayerNorm fused into both in-projection matmuls (no standalone LN kernel / HBM pass).
    y_qkv = ln_linear(x2, params["in_norm_w"], params["in_norm_b"], w_qkv_in_t, b_qkv_in, eps=eps)
    y_mlp = ln_linear(x2, params["in_norm_w"], params["in_norm_b"], w_mlp_in_t, b_mlp_in, eps=eps)

    # Attention straight off the qkv projection; output already in (B*N, C) layout.
    # q_norm / k_norm are Identity (qk_norm=False); attn/proj/drop_path dropouts are p=0.
    x_attn = mhsa(y_qkv, batch=B, seq=N, num_heads=H, head_dim=Dh)
    x_attn = linear(x_attn, params["attn_out_w"].T.astype(jnp.bfloat16),
                    params["attn_out_b"].astype(jnp.float32))

    gamma = params["ls_gamma"]
    if gamma is None:                                            # ls = Identity
        gamma = jnp.ones((C,), jnp.float32)
    out = mlp_out_residual(y_mlp, params["mlp_out_w"].T.astype(jnp.bfloat16),
                           params["mlp_out_b"].astype(jnp.float32),
                           x2, x_attn, gamma.astype(jnp.float32))
    return out.reshape(B, N, C)


# ---------------------------------------------------------------------------
# Pure-JAX reference (same bf16 matmul operands / tanh GELU; exact divide in softmax)
# ---------------------------------------------------------------------------

def reference_block(x, params, *, num_heads, eps=1e-5):
    B, N, C = x.shape
    H = num_heads
    Dh = C // H
    scale = Dh ** -0.5
    mlp_hidden = params["mlp_bias"].shape[0]
    bf = jnp.bfloat16

    xf = x.astype(jnp.float32)
    mean = jnp.mean(xf, axis=-1, keepdims=True)
    var = jnp.mean((xf - mean) ** 2, axis=-1, keepdims=True)
    y = (xf - mean) * jax.lax.rsqrt(var + eps) * params["in_norm_w"] + params["in_norm_b"]

    in_bias = jnp.concatenate([params["qkv_bias"], params["mlp_bias"]])
    y = jnp.dot(y.astype(bf), params["in_proj_w"].astype(bf).T,
                preferred_element_type=jnp.float32) + in_bias
    x_mlp, q, k, v = jnp.split(y, [mlp_hidden, mlp_hidden + C, mlp_hidden + 2 * C], axis=-1)

    def heads(t):
        return t.reshape(B, N, H, Dh).transpose(0, 2, 1, 3)

    q, k, v = heads(q) * scale, heads(k), heads(v)
    s = jnp.einsum("bhnd,bhmd->bhnm", q.astype(bf), k.astype(bf),
                   preferred_element_type=jnp.float32)
    m = jnp.max(s, axis=-1, keepdims=True)
    p = jnp.exp(s - m)
    denom = jnp.sum(p, axis=-1, keepdims=True)
    x_attn = jnp.einsum("bhnm,bhmd->bhnd", p.astype(bf), v.astype(bf),
                        preferred_element_type=jnp.float32) / denom
    x_attn = x_attn.transpose(0, 2, 1, 3).reshape(B, N, C)
    x_attn = jnp.dot(x_attn.astype(bf), params["attn_out_w"].astype(bf).T,
                     preferred_element_type=jnp.float32) + params["attn_out_b"]

    x_mlp = jax.nn.gelu(x_mlp, approximate=True)
    x_mlp = jnp.dot(x_mlp.astype(bf), params["mlp_out_w"].astype(bf).T,
                    preferred_element_type=jnp.float32) + params["mlp_out_b"]

    gamma = params["ls_gamma"] if params["ls_gamma"] is not None else 1.0
    return x + gamma * (x_attn + x_mlp)


# ---------------------------------------------------------------------------

if __name__ == "__main__":
    key = jax.random.PRNGKey(0)

    B, N, C, H = 2, 16, 64, 4               # batch, tokens, dim, heads
    mlp_hidden = int(4.0 * C)
    in_proj_out = mlp_hidden + 3 * C
    init_values = 0.5                        # exercise the LayerScale path

    ks = jax.random.split(key, 8)
    x = jax.random.normal(ks[0], (B, N, C), dtype=jnp.float32)
    params = {
        "in_norm_w": 1.0 + 0.1 * jax.random.normal(ks[1], (C,), jnp.float32),
        "in_norm_b": 0.1 * jax.random.normal(ks[2], (C,), jnp.float32),
        "in_proj_w": jax.random.normal(ks[3], (in_proj_out, C), jnp.float32) / math.sqrt(C),
        "qkv_bias": jnp.zeros((3 * C,), jnp.float32),       # constant zero buffer (qkv_bias=False)
        "mlp_bias": jnp.zeros((mlp_hidden,), jnp.float32),  # trainable, zero-init
        "attn_out_w": jax.random.normal(ks[4], (C, C), jnp.float32) / math.sqrt(C),
        "attn_out_b": 0.02 * jax.random.normal(ks[5], (C,), jnp.float32),
        "mlp_out_w": jax.random.normal(ks[6], (C, mlp_hidden), jnp.float32) / math.sqrt(mlp_hidden),
        "mlp_out_b": 0.02 * jax.random.normal(ks[7], (C,), jnp.float32),
        "ls_gamma": init_values * jnp.ones((C,), jnp.float32),
    }

    y = parallel_scaling_block(x, params, num_heads=H)
    y = jax.block_until_ready(y)

    y_ref = reference_block(x, params, num_heads=H)
    assert y.shape == x.shape
    max_diff = float(jnp.max(jnp.abs(y - y_ref)))
    assert jnp.allclose(y, y_ref, rtol=1e-2, atol=1e-2), f"max |diff| = {max_diff}"

    print("KERNEL_OK")
</pallas_src>

<mosaic_0001>
module attributes {stable_mosaic.version = 11 : i64} {
  func.func @_ln_matmul_kernel(%arg0: i32, %arg1: i32, %arg2: memref<32x64xf32, #tpu.memory_space<vmem>>, %arg3: memref<1x64xf32, #tpu.memory_space<vmem>>, %arg4: memref<1x64xf32, #tpu.memory_space<vmem>>, %arg5: memref<64x192xbf16, #tpu.memory_space<vmem>>, %arg6: memref<1x192xf32, #tpu.memory_space<vmem>>, %arg7: memref<32x192xf32, #tpu.memory_space<vmem>>) attributes {dimension_semantics = [#tpu.dimension_semantics<parallel>, #tpu.dimension_semantics<parallel>], iteration_bounds = array<i64: 1, 1>, scalar_prefetch = 0 : i64, scratch_operands = 0 : i64, tpu.core_type = #tpu.core_type<tc>, window_params = [{transform_indices = @transform_0, window_bounds = array<i64: 32, 64>}, {pipeline_mode = #tpu.pipeline_mode<synchronous>, transform_indices = @transform_1, window_bounds = array<i64: 1, 64>}, {pipeline_mode = #tpu.pipeline_mode<synchronous>, transform_indices = @transform_2, window_bounds = array<i64: 1, 64>}, {transform_indices = @transform_3, window_bounds = array<i64: 64, 192>}, {transform_indices = @transform_4, window_bounds = array<i64: 1, 192>}, {transform_indices = @transform_5, window_bounds = array<i64: 32, 192>}]} {
    %c0 = arith.constant 0 : index
    %c0_0 = arith.constant 0 : index
    %0 = vector.load %arg2[%c0, %c0_0] : memref<32x64xf32, #tpu.memory_space<vmem>>, vector<32x64xf32>
    %cst = arith.constant dense<0.000000e+00> : vector<32xf32>
    %1 = vector.multi_reduction <add>, %0, %cst [1] : vector<32x64xf32> to vector<32xf32>
    %2 = vector.shape_cast %1 : vector<32xf32> to vector<32x1xf32>
    %cst_1 = arith.constant 6.400000e+01 : f32
    %3 = vector.broadcast %cst_1 : f32 to vector<32x1xf32>
    %4 = arith.divf %2, %3 : vector<32x1xf32>
    %5 = vector.broadcast %4 : vector<32x1xf32> to vector<32x64xf32>
    %6 = arith.subf %0, %5 : vector<32x64xf32>
    %7 = arith.mulf %6, %6 : vector<32x64xf32>
    %cst_2 = arith.constant dense<0.000000e+00> : vector<32xf32>
    %8 = vector.multi_reduction <add>, %7, %cst_2 [1] : vector<32x64xf32> to vector<32xf32>
    %9 = vector.shape_cast %8 : vector<32xf32> to vector<32x1xf32>
    %cst_3 = arith.constant 6.400000e+01 : f32
    %10 = vector.broadcast %cst_3 : f32 to vector<32x1xf32>
    %11 = arith.divf %9, %10 : vector<32x1xf32>
    %cst_4 = arith.constant 9.99999974E-6 : f32
    %12 = vector.broadcast %cst_4 : f32 to vector<32x1xf32>
    %13 = arith.addf %11, %12 : vector<32x1xf32>
    %14 = math.rsqrt %13 : vector<32x1xf32>
    %15 = vector.broadcast %14 : vector<32x1xf32> to vector<32x64xf32>
    %16 = arith.mulf %6, %15 : vector<32x64xf32>
    %c0_5 = arith.constant 0 : index
    %c0_6 = arith.constant 0 : index
    %17 = vector.load %arg3[%c0_5, %c0_6] : memref<1x64xf32, #tpu.memory_space<vmem>>, vector<1x64xf32>
    %18 = vector.broadcast %17 : vector<1x64xf32> to vector<32x64xf32>
    %19 = arith.mulf %16, %18 : vector<32x64xf32>
    %c0_7 = arith.constant 0 : index
    %c0_8 = arith.constant 0 : index
    %20 = vector.load %arg4[%c0_7, %c0_8] : memref<1x64xf32, #tpu.memory_space<vmem>>, vector<1x64xf32>
    %21 = vector.broadcast %20 : vector<1x64xf32> to vector<32x64xf32>
    %22 = arith.addf %19, %21 : vector<32x64xf32>
    %23 = arith.truncf %22 : vector<32x64xf32> to vector<32x64xbf16>
    %c0_9 = arith.constant 0 : index
    %c0_10 = arith.constant 0 : index
    %24 = vector.load %arg5[%c0_9, %c0_10] : memref<64x192xbf16, #tpu.memory_space<vmem>>, vector<64x192xbf16>
    %cst_11 = arith.constant dense<0.000000e+00> : vector<32x192xf32>
    %25 = tpu.matmul %23, %24, %cst_11 {dimension_numbers = #tpu.dot_dimension_numbers<[1], [0], [0], [1], [0, 0, 1, 1], [], []>} : vector<32x64xbf16>, vector<64x192xbf16>, vector<32x192xf32> -> vector<32x192xf32>
    %c0_12 = arith.constant 0 : index
    %c0_13 = arith.constant 0 : index
    %26 = vector.load %arg6[%c0_12, %c0_13] : memref<1x192xf32, #tpu.memory_space<vmem>>, vector<1x192xf32>
    %27 = vector.broadcast %26 : vector<1x192xf32> to vector<32x192xf32>
    %28 = arith.addf %25, %27 : vector<32x192xf32>
    %c0_14 = arith.constant 0 : index
    %c0_15 = arith.constant 0 : index
    %29 = vector.load %arg7[%c0_14, %c0_15] : memref<32x192xf32, #tpu.memory_space<vmem>>, vector<32x192xf32>
    tpu.vector_store %arg7[%c0_14, %c0_15], %28 {strides = array<i32>} : memref<32x192xf32, #tpu.memory_space<vmem>>, vector<32x192xf32>,
    return
  }
  func.func @transform_0(%arg0: i32, %arg1: i32) -> (i32, i32) {
    %c0_i32 = arith.constant 0 : i32
    %c0_i32_0 = arith.constant 0 : i32
    return %arg0, %c0_i32 : i32, i32
  }
  func.func @transform_1(%arg0: i32, %arg1: i32) -> (i32, i32) {
    %c0_i32 = arith.constant 0 : i32
    %c0_i32_0 = arith.constant 0 : i32
    %c0_i32_1 = arith.constant 0 : i32
    return %c0_i32, %c0_i32_0 : i32, i32
  }
  func.func @transform_2(%arg0: i32, %arg1: i32) -> (i32, i32) {
    %c0_i32 = arith.constant 0 : i32
    %c0_i32_0 = arith.constant 0 : i32
    %c0_i32_1 = arith.constant 0 : i32
    return %c0_i32, %c0_i32_0 : i32, i32
  }
  func.func @transform_3(%arg0: i32, %arg1: i32) -> (i32, i32) {
    %c0_i32 = arith.constant 0 : i32
    %c0_i32_0 = arith.constant 0 : i32
    return %c0_i32, %arg1 : i32, i32
  }
  func.func @transform_4(%arg0: i32, %arg1: i32) -> (i32, i32) {
    %c0_i32 = arith.constant 0 : i32
    %c0_i32_0 = arith.constant 0 : i32
    return %c0_i32, %arg1 : i32, i32
  }
  func.func @transform_5(%arg0: i32, %arg1: i32) -> (i32, i32) {
    %c0_i32 = arith.constant 0 : i32
    return %arg0, %arg1 : i32, i32
  }
}

</mosaic_0001>

<bundles_post_ra>
// kernel: tpu_custom_call.1
= control target key start
LH: loop header
LB: loop body
LE: loop exit
PB: predicated region body
PF: predicated region fallthrough
CT: control target
= control target key end

     0   :  { %10 = vsyncpa [#allocation3], 0  ;;  %s589_s0 = inlined_call_operand.hbm [shape: f32[32,64], index: 0, kind: input, shape index: {}]   ;;  %s590_s1 = inlined_call_operand.hbm [shape: f32[1,64], index: 1, kind: input, shape index: {}]   ;;  %s591_s2 = inlined_call_operand.vmem [shape: f32[1,64], index: 2, kind: input, shape index: {}]   ;;  %s592_s3 = inlined_call_operand.hbm [shape: bf16[64,192], index: 3, kind: input, shape index: {}]   ;;  %s593_s4 = inlined_call_operand.vmem [shape: f32[1,192], index: 4, kind: input, shape index: {}]   ;;  %s594_s5 = inlined_call_operand.hbm [shape: f32[32,192], index: 5, kind: output, shape index: {}]  }
   0x1   :  { %11 = vsyncpa [#allocation6], 0  ;;  %s31_s20 = sshll.u32 %s590_s1, 4  ;;  %s32_s20 = int_to_ptr.hbm [resolvable:$true] %s31_s20 }
   0x2   :  { %12 = vsyncpa [#allocation4], 0  ;;  %s486_s21 = smov [#allocation5]   ;;  %s17_s25 = sshll.u32 %s589_s0, 4  ;;  %s18_s25 = int_to_ptr.hbm [resolvable:$true] %s17_s25 }
   0x3   :  { %s33_s22 = sshll.u32 %s486_s21, 4  ;;  %s487_s26 = smov [#allocation2]   ;;  %s34_s22 = int_to_ptr.vmem [resolvable:$true] %s33_s22 }
   0x4   :  { %36 = dma.hbm_to_vmem [thread:$0]  %s32_s20, 16, %s34_s22, [#allocation6]  }
   0x5   :  { %s19_s27 = sshll.u32 %s487_s26, 4  ;;  %s488_s28 = smov 128   ;;  %s20_s27 = int_to_ptr.vmem [resolvable:$true] %s19_s27 }
   0x6   :  { %s489_s29 = smov 8   ;;  %s43_s1 = sshll.u32 %s592_s3, 4  ;;  %s44_s1 = int_to_ptr.hbm [resolvable:$true] %s43_s1 }
   0x7   :  { %25 = dma.hbm_to_vmem [thread:$0]  %s18_s25, 512, %s20_s27, [#allocation3], %s488_s28, %s488_s28, %s489_s29  }
   0x8   :  { %s490_s7 = smov [#allocation7]  }
   0x9   :  { %s45_s8 = sshll.u32 %s490_s7, 4  ;;  %s46_s8 = int_to_ptr.vmem [resolvable:$true] %s45_s8 }
   0xa   :  { %51 = dma.hbm_to_vmem [thread:$0]  %s44_s1, 1024, %s46_s8, [#allocation6], %s488_s28, %s488_s28, %s489_s29  }
   0xb   :  { %480 = dma.done.wait [#allocation3], 512  }
   0xc   :  { %481 = vsyncadd [#allocation3], 4294966784 }
   0xd   :  { %482 = dma.done.wait [#allocation6], 1040  }
   0xe   :  { %483 = vsyncadd [#allocation6], 4294966256  ;;  %vm71_vm0 = vcmask 523264   ;;  %v69_v0 = vld [vmem:[#allocation2 + $0x10] sm:$0xff]  ;;  %v67_v1 = vld [vmem:[#allocation2] sm:$0xff]  ;;  %v491_v8 = vmov 64.0  }
   0xf   :  { %v78_v2 = vsel %vm71_vm0, %v69_v0, 0.0  ;;  %v72_v3 = vsel %vm71_vm0, %v67_v1, 0.0  ;;  %v70_v4 = vld [vmem:[#allocation2 + $0x18] sm:$0xff]  ;;  %v68_v5 = vld [vmem:[#allocation2 + $0x8] sm:$0xff]  ;;  %374 = vrcp.f32 %v491_v8  ;;  %v337_v35 = vld [vmem:[#allocation7 + $0x30] sm:$0xf] }
  0x10   :  { %79 = vadd.xlane.f32.xlu0 %v78_v2  ;;  %73 = vadd.xlane.f32.xlu1 %v72_v3  ;;  %v81_v6 = vsel %vm71_vm0, %v70_v4, 0.0  ;;  %v75_v7 = vsel %vm71_vm0, %v68_v5, 0.0  ;;  %v354_v36 = vld [vmem:[#allocation7 + $0x34] sm:$0xf0]  ;;  %v353_v37 = vld [vmem:[#allocation7 + $0x34] sm:$0xf] }
  0x11   :  { %v338_v38 = vor.u32 %v354_v36, %v337_v35  ;;  %v339_v39 = vld [vmem:[#allocation7 + $0x38] sm:$0xf0]  ;;  %v329_v41 = vld [vmem:[#allocation7 + $0x20] sm:$0xf]  ;;  %v352_v42 = vld [vmem:[#allocation7 + $0x24] sm:$0xf0] }
  0x12   :  { %v342_v40 = vor.u32 %v353_v37, %v339_v39  ;;  %v351_v43 = vld [vmem:[#allocation7 + $0x24] sm:$0xf]  ;;  %v330_v44 = vor.u32 %v352_v42, %v329_v41  ;;  %v331_v45 = vld [vmem:[#allocation7 + $0x28] sm:$0xf0]  ;;  %v321_v47 = vld [vmem:[#allocation7 + $0x10] sm:$0xf] }
  0x13   :  { %249 = vmatpush.bf16.msra.mxu0 %v338_v38  ;;  %355 = vmatpush.bf16.msra.mxu2 %v338_v38  ;;  %v334_v46 = vor.u32 %v351_v43, %v331_v45  ;;  %v350_v48 = vld [vmem:[#allocation7 + $0x14] sm:$0xf0]  ;;  %v349_v49 = vld [vmem:[#allocation7 + $0x14] sm:$0xf]  ;;  %v323_v51 = vld [vmem:[#allocation7 + $0x18] sm:$0xf0] }
  0x14   :  { %268 = vmatpush.bf16.msra.mxu1 %v342_v40  ;;  %359 = vmatpush.bf16.msra.mxu3 %v342_v40  ;;  %v322_v50 = vor.u32 %v350_v48, %v321_v47  ;;  %v326_v54 = vor.u32 %v349_v49, %v323_v51  ;;  %v313_v55 = vld [vmem:[#allocation7] sm:$0xf]  ;;  %v348_v56 = vld [vmem:[#allocation7 + $0x4] sm:$0xf0]  ;;  %v347_v57 = vld [vmem:[#allocation7 + $0x4] sm:$0xf] }
  0x15   :  { %v375_v9 = vpop.eup %374  ;;  %v314_v60 = vor.u32 %v348_v56, %v313_v55  ;;  %v315_v61 = vld [vmem:[#allocation7 + $0x8] sm:$0xf0]  ;;  %v372_v36 = vld [vmem:[#allocation5] ss:$0 sm:$0xff]  ;;  %s297_s13 = sshll.u32 %s594_s5, 4  ;;  %s493_s14 = smov 256   ;;  %s298_s13 = int_to_ptr.hbm [resolvable:$true] %s297_s13 }
  0x16   :  { %v85_v10 = vmul.f32 64.0, %v375_v9  ;;  %vm89_vm1 = vweird.f32 %v375_v9  ;;  %v318_v62 = vor.u32 %v347_v57, %v315_v61  ;;  %v373_v43 = vld [vmem:[%s591_s2] ss:$0 sm:$0xff]  ;;  %s494_s15 = smov 16  }
  0x17   :  { %250 = vmatpush.bf16.msra.mxu0 %v330_v44  ;;  %356 = vmatpush.bf16.msra.mxu2 %v330_v44 }
  0x18   :  { %82 = vadd.xlane.f32.xlu0 %v81_v6  ;;  %76 = vadd.xlane.f32.xlu1 %v75_v7  ;;  %v86_v11 = vsub.f32 1.0, %v85_v10 }
  0x19   :  { %269 = vmatpush.bf16.msra.mxu1 %v334_v46  ;;  %360 = vmatpush.bf16.msra.mxu3 %v334_v46 }
  0x1a   :  { %v87_v12 = vmul.f32 %v375_v9, %v86_v11 }
  0x1b   :  { %251 = vmatpush.bf16.msra.mxu0 %v322_v50  ;;  %357 = vmatpush.bf16.msra.mxu2 %v322_v50 }
  0x1c   :  { %v88_v13 = vadd.f32 %v375_v9, %v87_v12 }
  0x1d   :  { %270 = vmatpush.bf16.msra.mxu1 %v326_v54  ;;  %361 = vmatpush.bf16.msra.mxu3 %v326_v54 }
  0x1e   :  { %v538_v14 = vsel %vm89_vm1, %v375_v9, %v88_v13 }
  0x1f   :  { %252 = vmatpush.bf16.msra.mxu0 %v314_v60  ;;  %358 = vmatpush.bf16.msra.mxu2 %v314_v60 }
  0x21   :  { %271 = vmatpush.bf16.msra.mxu1 %v318_v62  ;;  %362 = vmatpush.bf16.msra.mxu3 %v318_v62 }
  0x83   :  { %v80_v15 = vpop.xlane.xlu0 %79  ;;  %v74_v16 = vpop.xlane.xlu1 %73 }
  0x84   :  { %v93_v17 = vmul.f32 %v538_v14, %v80_v15  ;;  %v91_v18 = vmul.f32 %v538_v14, %v74_v16 }
  0x86   :  { %v542_v19 = vsub.f32 %v69_v0, %v93_v17  ;;  %v544_v20 = vsub.f32 %v67_v1, %v91_v18 }
  0x88   :  { %v101_v21 = vmul.f32 %v542_v19, %v542_v19  ;;  %v99_v22 = vmul.f32 %v544_v20, %v544_v20 }
  0x8a   :  { %v109_v23 = vsel %vm71_vm0, %v101_v21, 0.0  ;;  %v103_v24 = vsel %vm71_vm0, %v99_v22, 0.0 }
  0x8b   :  { %110 = vadd.xlane.f32.xlu2 %v109_v23  ;;  %v83_v25 = vpop.xlane.xlu0 %82  ;;  %104 = vadd.xlane.f32.xlu0 %v103_v24  ;;  %v77_v26 = vpop.xlane.xlu1 %76 }
  0x8c   :  { %v94_v27 = vmul.f32 %v538_v14, %v83_v25  ;;  %v92_v28 = vmul.f32 %v538_v14, %v77_v26 }
  0x8e   :  { %v554_v29 = vsub.f32 %v70_v4, %v94_v27  ;;  %v556_v30 = vsub.f32 %v68_v5, %v92_v28 }
  0x90   :  { %v102_v31 = vmul.f32 %v554_v29, %v554_v29  ;;  %v100_v32 = vmul.f32 %v556_v30, %v556_v30 }
  0x92   :  { %v112_v33 = vsel %vm71_vm0, %v102_v31, 0.0  ;;  %v106_v34 = vsel %vm71_vm0, %v100_v32, 0.0 }
  0x93   :  { %113 = vadd.xlane.f32.xlu2 %v112_v33  ;;  %107 = vadd.xlane.f32.xlu1 %v106_v34 }
  0xfe   :  { %v111_v52 = vpop.xlane.xlu2 %110  ;;  %v105_v53 = vpop.xlane.xlu0 %104 }
  0xff   :  { %v117_v58 = vmul.f32 %v111_v52, %v538_v14  ;;  %v115_v59 = vmul.f32 %v105_v53, %v538_v14 }
 0x101   :  { %v121_v63 = vadd.f32 1e-05, %v117_v58  ;;  %v119_v0 = vadd.f32 1e-05, %v115_v59 }
 0x103   :  { %376 = vrsqrt.f32 %v121_v63  ;;  %vm129_vm3 = vweird.f32 %v119_v0  ;;  %vm149_vm5 = vweird.f32 %v121_v63 }
 0x104   :  { %378 = vrsqrt.f32 %v119_v0 }
 0x106   :  { %v114_v1 = vpop.xlane.xlu2 %113  ;;  %v108_v2 = vpop.xlane.xlu1 %107 }
 0x107   :  { %v118_v3 = vmul.f32 %v114_v1, %v538_v14  ;;  %v116_v4 = vmul.f32 %v108_v2, %v538_v14 }
 0x109   :  { %v377_v5 = vpop.eup %376  ;;  %v122_v6 = vadd.f32 1e-05, %v118_v3  ;;  %v120_v7 = vadd.f32 1e-05, %v116_v4 }
 0x10a   :  { %v379_v8 = vpop.eup %378  ;;  %v144_v9 = vmul.f32 %v377_v5, %v121_v63  ;;  %vm150_vm2 = vweird.f32 %v377_v5 }
 0x10b   :  { %v124_v10 = vmul.f32 %v379_v8, %v119_v0  ;;  %380 = vrsqrt.f32 %v122_v6  ;;  %vm130_vm4 = vweird.f32 %v379_v8  ;;  %vm151_vm6 = vmor %vm149_vm5, %vm150_vm2  ;;  %vm139_vm9 = vweird.f32 %v120_v7 }
 0x10c   :  { %v145_v11 = vmul.f32 %v377_v5, %v144_v9  ;;  %382 = vrsqrt.f32 %v120_v7  ;;  %vm131_vm7 = vmor %vm129_vm3, %vm130_vm4  ;;  %vm159_vm11 = vweird.f32 %v122_v6 }
 0x10d   :  { %v125_v12 = vmul.f32 %v379_v8, %v124_v10 }
 0x10e   :  { %v146_v13 = vmul.f32 0.5, %v145_v11 }
 0x10f   :  { %v126_v15 = vmul.f32 0.5, %v125_v12 }
 0x110   :  { %v147_v16 = vsub.f32 1.5, %v146_v13 }
 0x111   :  { %v381_v17 = vpop.eup %380  ;;  %v127_v18 = vsub.f32 1.5, %v126_v15 }
 0x112   :  { %v383_v21 = vpop.eup %382  ;;  %v148_v22 = vmul.f32 %v377_v5, %v147_v16  ;;  %v154_v23 = vmul.f32 %v381_v17, %v122_v6  ;;  %vm160_vm8 = vweird.f32 %v381_v17 }
 0x113   :  { %v128_v14 = vmul.f32 %v379_v8, %v127_v18  ;;  %v134_v24 = vmul.f32 %v383_v21, %v120_v7  ;;  %vm140_vm10 = vweird.f32 %v383_v21  ;;  %vm161_vm12 = vmor %vm159_vm11, %vm160_vm8 }
 0x114   :  { %v155_v25 = vmul.f32 %v381_v17, %v154_v23  ;;  %v152_v27 = vsel %vm151_vm6, %v377_v5, %v148_v22  ;;  %vm141_vm13 = vmor %vm139_vm9, %vm140_vm10 }
 0x115   :  { %v135_v26 = vmul.f32 %v383_v21, %v134_v24  ;;  %v132_v31 = vsel %vm131_vm7, %v379_v8, %v128_v14  ;;  %v165_v34 = vmul.f32 %v152_v27, %v542_v19 }
 0x116   :  { %v156_v28 = vmul.f32 0.5, %v155_v25  ;;  %v163_v37 = vmul.f32 %v132_v31, %v544_v20 }
 0x117   :  { %v136_v32 = vmul.f32 0.5, %v135_v26  ;;  %v173_v19 = vmul.f32 %v372_v36, %v165_v34 }
 0x118   :  { %v157_v33 = vsub.f32 1.5, %v156_v28  ;;  %v171_v45 = vmul.f32 %v372_v36, %v163_v37 }
 0x119   :  { %v137_v35 = vsub.f32 1.5, %v136_v32  ;;  %v181_v20 = vadd.f32 %v373_v43, %v173_v19 }
 0x11a   :  { %v158_v38 = vmul.f32 %v381_v17, %v157_v33  ;;  %v179_v49 = vadd.f32 %v373_v43, %v171_v45 }
 0x11b   :  { %v138_v39 = vmul.f32 %v383_v21, %v137_v35 }
 0x11c   :  { %v162_v40 = vsel %vm161_vm12, %v381_v17, %v158_v38 }
 0x11d   :  { %v166_v41 = vmul.f32 %v162_v40, %v554_v29  ;;  %v142_v42 = vsel %vm141_vm13, %v383_v21, %v138_v39  ;;  %v193_v29 = vld [vmem:[%s593_s4] sm:$0x3]  ;;  %s492_s4 = smov [#allocation8]  }
 0x11e   :  { %v164_v44 = vmul.f32 %v142_v42, %v556_v30  ;;  %v195_v30 = vperm.slane %v193_v29, 0  ;;  %v196_v53 = vperm.slane %v193_v29, 1  ;;  %s295_s10 = sshll.u32 %s492_s4, 4  ;;  %s296_s10 = int_to_ptr.vmem [resolvable:$true] %s295_s10 }
 0x11f   :  { %v174_v46 = vmul.f32 %v372_v36, %v166_v41 }
 0x120   :  { %v172_v47 = vmul.f32 %v372_v36, %v164_v44 }
 0x121   :  { %v182_v48 = vadd.f32 %v373_v43, %v174_v46 }
 0x122   :  { %v180_v50 = vadd.f32 %v373_v43, %v172_v47 }
 0x123   :  { %v184_v51 = vpack.c.bf16 %v182_v48, %v181_v20 }
 0x124   :  { %v183_v52 = vpack.c.bf16 %v180_v50, %v179_v49 }
 0x125   :  { %344 = vmatmul.msk.bf16.vlgmr.msra.gmra.mxu2 %vm71_vm0, %v184_v51  ;;  %346 = vmatmul.msk.bf16.vlgmr.msra.gmra.mxu3 %vm71_vm0, %v184_v51 }
 0x126   :  { %343 = vmatmul.msk.bf16.vlgmr.msra.gmra.mxu0 %vm71_vm0, %v183_v52  ;;  %345 = vmatmul.msk.bf16.vlgmr.msra.gmra.mxu1 %vm71_vm0, %v183_v52 }
 0x1a3   :  { %v254_v54 = vpop.f32.mrf.mxu0  ;;  %v273_v55 = vpop.f32.mrf.mxu1 }
 0x1a4   :  { %v255_v56 = vadd.f32 %v254_v54, %v195_v30  ;;  %v274_v57 = vadd.f32 %v273_v55, %v196_v53 }
 0x1a6   :  { %283 = vst [vmem:[#allocation8] sm:$0xff] %v255_v56 }
 0x1a7   :  { %284 = vst.msk [vmem:[#allocation8 + $0x8] sm:$0xff] %vm71_vm0, %v274_v57 }
 0x1a8   :  { %v259_v58 = vpop.f32.mrf.mxu2  ;;  %v278_v59 = vpop.f32.mrf.mxu3 }
 0x1a9   :  { %v260_v60 = vadd.f32 %v259_v58, %v195_v30  ;;  %v279_v61 = vadd.f32 %v278_v59, %v196_v53 }
 0x1ab   :  { %287 = vst [vmem:[#allocation8 + $0x20] sm:$0xff] %v260_v60  ;;  %v256_v62 = vpop.f32.mrf.mxu0  ;;  %v275_v63 = vpop.f32.mrf.mxu1 }
 0x1ac   :  { %288 = vst.msk [vmem:[#allocation8 + $0x28] sm:$0xff] %vm71_vm0, %v279_v61  ;;  %v257_v0 = vadd.f32 %v256_v62, %v195_v30  ;;  %v276_v1 = vadd.f32 %v275_v63, %v196_v53 }
 0x1ae   :  { %285 = vst [vmem:[#allocation8 + $0x10] sm:$0xff] %v257_v0 }
 0x1af   :  { %286 = vst.msk [vmem:[#allocation8 + $0x18] sm:$0xff] %vm71_vm0, %v276_v1 }
 0x1b0   :  { %v261_v2 = vpop.f32.mrf.mxu2  ;;  %v280_v3 = vpop.f32.mrf.mxu3 }
 0x1b1   :  { %v262_v4 = vadd.f32 %v261_v2, %v195_v30  ;;  %v281_v5 = vadd.f32 %v280_v3, %v196_v53 }
 0x1b3   :  { %289 = vst [vmem:[#allocation8 + $0x30] sm:$0xff] %v262_v4 }
 0x1b4   :  { %290 = vst.msk [vmem:[#allocation8 + $0x38] sm:$0xff] %vm71_vm0, %v281_v5 }
 0x1b5   :  { %303 = dma.vmem_to_hbm [thread:$0]  %s296_s10, 1024, %s298_s13, [#allocation4], %s493_s14, %s493_s14, %s494_s15  }
 0x1b6   :  { %484 = dma.done.wait [#allocation4], 1024  }
 0x1b7   :  { %485 = vsyncadd [#allocation4], 4294966272 }
 0x1b8   :  { %308 = vsyncpa [#allocation3], 1 }
 0x1b9   :  { %309 = vsyncpa [#allocation6], 1 }
 0x1ba   :  { %310 = vsyncpa [#allocation4], 1 }

</bundles_post_ra>
